<compile_context>
chip_gen: v7x
topology: tpu7x:2x2x1
jax: 0.10.0
libtpu: 0.0.40
codegen_flags: <defaults>
</compile_context>

<pallas_src>
import functools

import jax
import jax.numpy as jnp
import numpy as np
from jax.experimental import pallas as pl
from jax.experimental.pallas import tpu as pltpu

LANES = 128


def _round_up(x, m):
    return (x + m - 1) // m * m


def gnimc_kernel(z_ref, h_ref, slab_ref, out_ref, *, q_pad, h_pad, num_hints):
    """One fused GNIMC forward step on a (TB,) batch tile."""
    NH = num_hints

    z = z_ref[...]                                            # (TB, Qp) f32
    h = h_ref[...]                                            # (TB, Hp) f32

    # One MXU pass per input stream (fused [W_cls | U], zero-padded V).
    zu = jnp.dot(z, slab_ref[pl.ds(0, q_pad), :],
                 preferred_element_type=jnp.float32)          # logits@[0:NH], u@[NH:NH+R]
    hv = jnp.dot(h, slab_ref[pl.ds(q_pad, h_pad), :],
                 preferred_element_type=jnp.float32)          # v@[NH:NH+R], 0 elsewhere

    aux = slab_ref[pl.ds(q_pad + h_pad, 8), :]                # (8, 128)
    bias_row = aux[0:1, :]                                    # classifier bias
    wvu_row = aux[1:2, :]                                     # var_raw weight, u part
    wvv_row = aux[2:3, :]                                     # var_raw weight, v part
    wabs_row = aux[3:4, :]                                    # var_raw |u-v| weight (masked)
    mu_bias = aux[4:5, 0:1]                                   # (1,1): w_z + b_z + w_h + b_h
    var_bias = aux[4:5, 1:2]                                  # (1,1): var_raw bias

    # mu = sum(u*v) + bias_z(1) + bias_h(1).  hv is exactly zero outside the
    # u/v lanes, so the full-width product is exact.
    mu = jnp.sum(zu * hv, axis=1, keepdims=True) + mu_bias    # (TB, 1)

    # var_raw(cat([u, v, |u-v|.sum])) entirely on VPU + XLU; per-lane weights
    # are zero outside [NH:NH+R], so no masking is needed.
    raw = (jnp.sum(zu * wvu_row + hv * wvv_row + jnp.abs(zu - hv) * wabs_row,
                   axis=1, keepdims=True)
           + var_bias)                                        # (TB, 1)
    sig = jax.nn.softplus(raw) + 1e-4

    # Lane-dense packed output: [0:NH]=logits, [NH]=mu, [NH+1]=sig, rest junk.
    out = zu + bias_row
    lane = jax.lax.broadcasted_iota(jnp.int32, out.shape, 1)
    out = jnp.where(lane == NH, mu, out)
    out = jnp.where(lane == NH + 1, sig, out)
    out_ref[...] = out


def init_params(key, q_dim, h_dim, rank, num_hints):
    ks = jax.random.split(key, 8)
    return {
        "U": jax.random.normal(ks[0], (q_dim, rank), jnp.float32) * 0.2,
        "V": jax.random.normal(ks[1], (h_dim, rank), jnp.float32) * 0.2,
        # bias_z / bias_h : nn.Linear(1, 1)
        "bias_z_w": jax.random.normal(ks[2], (1, 1), jnp.float32) * 0.5,
        "bias_z_b": jax.random.normal(ks[3], (1,), jnp.float32) * 0.5,
        "bias_h_w": jax.random.normal(ks[4], (1, 1), jnp.float32) * 0.5,
        "bias_h_b": jnp.zeros((1,), jnp.float32) + 0.1,
        # var_raw : nn.Linear(2*rank+1, 1), bias zero-init (as in the module)
        "var_w": jax.random.normal(ks[5], (1, 2 * rank + 1), jnp.float32) * 0.1,
        "var_b": jnp.zeros((1,), jnp.float32),
        # classifier : nn.Linear(q_dim, num_hints)
        "cls_w": jax.random.normal(ks[6], (num_hints, q_dim), jnp.float32) * 0.1,
        "cls_b": jax.random.normal(ks[7], (num_hints,), jnp.float32) * 0.1,
    }


@jax.jit
def gnimc_forward(z, h, params):
    # Replicate the PyTorch broadcasting glue (plain JAX, not the hot path).
    if z.ndim == 1:
        z = z[None, :]
    if h.ndim == 1:
        h = h[None, :]
    if z.shape[0] != h.shape[0]:
        if z.shape[0] == 1:
            z = jnp.broadcast_to(z, (h.shape[0], z.shape[1]))
        if h.shape[0] == 1:
            h = jnp.broadcast_to(h, (z.shape[0], h.shape[1]))
    z = z.astype(jnp.float32)
    h = h.astype(jnp.float32)

    B, Q = z.shape
    H = h.shape[1]
    R = params["U"].shape[1]
    NH = params["cls_w"].shape[0]
    assert NH + R <= LANES and NH + 2 <= LANES, "features must fit in one 128-lane vreg"

    q_pad = _round_up(Q, 8)
    h_pad = _round_up(H, 8)
    slab_rows = q_pad + h_pad + 8

    # ---- single lane-dense parameter slab (constant per params; pure glue) ----
    wvar = params["var_w"].astype(jnp.float32)                      # (1, 2R+1)
    bias_sum = (params["bias_z_w"][0, 0] + params["bias_z_b"][0]
                + params["bias_h_w"][0, 0] + params["bias_h_b"][0]).astype(jnp.float32)

    slab = jnp.zeros((slab_rows, LANES), jnp.float32)
    slab = slab.at[:Q, 0:NH].set(params["cls_w"].T.astype(jnp.float32))
    slab = slab.at[:Q, NH:NH + R].set(params["U"].astype(jnp.float32))
    slab = slab.at[q_pad:q_pad + H, NH:NH + R].set(params["V"].astype(jnp.float32))
    slab = slab.at[q_pad + h_pad + 0, 0:NH].set(params["cls_b"].astype(jnp.float32))
    slab = slab.at[q_pad + h_pad + 1, NH:NH + R].set(wvar[0, :R])
    slab = slab.at[q_pad + h_pad + 2, NH:NH + R].set(wvar[0, R:2 * R])
    slab = slab.at[q_pad + h_pad + 3, NH:NH + R].set(wvar[0, 2 * R])
    slab = slab.at[q_pad + h_pad + 4, 0].set(bias_sum)
    slab = slab.at[q_pad + h_pad + 4, 1].set(params["var_b"][0].astype(jnp.float32))

    # ---- batch tiling: "parallel" grid axis over batch tiles ------------------
    b_pad = _round_up(B, 8)
    tb = min(b_pad, 512)
    b_pad = _round_up(b_pad, tb)
    zp = jnp.pad(z, ((0, b_pad - B), (0, q_pad - Q)))
    hp = jnp.pad(h, ((0, b_pad - B), (0, h_pad - H)))

    flops = 2 * b_pad * LANES * (q_pad + h_pad) + 12 * b_pad * LANES
    bytes_accessed = 4 * (b_pad * (q_pad + h_pad + LANES) + slab_rows * LANES)

    kernel = functools.partial(gnimc_kernel, q_pad=q_pad, h_pad=h_pad, num_hints=NH)

    packed = pl.pallas_call(
        kernel,
        out_shape=jax.ShapeDtypeStruct((b_pad, LANES), jnp.float32),
        grid_spec=pltpu.PrefetchScalarGridSpec(
            num_scalar_prefetch=0,
            grid=(b_pad // tb,),
            in_specs=[
                pl.BlockSpec((tb, q_pad), lambda i: (i, 0)),
                pl.BlockSpec((tb, h_pad), lambda i: (i, 0)),
                pl.BlockSpec((slab_rows, LANES), lambda i: (0, 0)),
            ],
            out_specs=pl.BlockSpec((tb, LANES), lambda i: (i, 0)),
        ),
        compiler_params=pltpu.CompilerParams(
            dimension_semantics=("parallel",)),
        cost_estimate=pl.CostEstimate(flops=flops, transcendentals=2 * b_pad,
                                      bytes_accessed=bytes_accessed),
    )(zp, hp, slab)

    logits = packed[:B, :NH]
    mu = packed[:B, NH]
    sig = packed[:B, NH + 1]
    return mu, sig, logits


def gnimc_reference(z, h, params):
    """Pure-JAX reference mirroring the PyTorch forward, for verification."""
    u = z @ params["U"]
    v = h @ params["V"]
    inter = jnp.sum(u * v, axis=1)
    ones = jnp.ones_like(inter)[:, None]
    bz = ones @ params["bias_z_w"].T + params["bias_z_b"]
    bh = ones @ params["bias_h_w"].T + params["bias_h_b"]
    mu = inter + bz[:, 0] + bh[:, 0]
    feat = jnp.concatenate(
        [u, v, jnp.sum(jnp.abs(u - v), axis=1, keepdims=True)], axis=1)
    sig = jax.nn.softplus(feat @ params["var_w"].T + params["var_b"])[:, 0] + 1e-4
    logits = z @ params["cls_w"].T + params["cls_b"]
    return mu, sig, logits


if __name__ == "__main__":
    # Small, module-consistent shapes.
    B, q_dim, h_dim, rank, num_hints = 8, 16, 32, 8, 8

    key = jax.random.PRNGKey(0)
    kp, kz, kh = jax.random.split(key, 3)
    params = init_params(kp, q_dim, h_dim, rank, num_hints)
    z = jax.random.normal(kz, (B, q_dim), jnp.float32)
    h = jax.random.normal(kh, (B, h_dim), jnp.float32)

    mu, sig, logits = gnimc_forward(z, h, params)
    jax.block_until_ready((mu, sig, logits))

    mu_ref, sig_ref, logits_ref = gnimc_reference(z, h, params)
    np.testing.assert_allclose(np.asarray(mu), np.asarray(mu_ref), rtol=1e-5, atol=1e-5)
    np.testing.assert_allclose(np.asarray(sig), np.asarray(sig_ref), rtol=1e-5, atol=1e-5)
    np.testing.assert_allclose(np.asarray(logits), np.asarray(logits_ref), rtol=1e-5, atol=1e-5)

    print("KERNEL_OK")
</pallas_src>

<mosaic_0001>
module attributes {stable_mosaic.version = 11 : i64} {
  func.func @gnimc_kernel(%arg0: i32, %arg1: memref<8x16xf32, #tpu.memory_space<vmem>>, %arg2: memref<8x32xf32, #tpu.memory_space<vmem>>, %arg3: memref<56x128xf32, #tpu.memory_space<vmem>>, %arg4: memref<8x128xf32, #tpu.memory_space<vmem>>) attributes {dimension_semantics = [#tpu.dimension_semantics<parallel>], iteration_bounds = array<i64: 1>, scalar_prefetch = 0 : i64, scratch_operands = 0 : i64, tpu.core_type = #tpu.core_type<tc>, window_params = [{transform_indices = @transform_0, window_bounds = array<i64: 8, 16>}, {transform_indices = @transform_1, window_bounds = array<i64: 8, 32>}, {pipeline_mode = #tpu.pipeline_mode<synchronous>, transform_indices = @transform_2, window_bounds = array<i64: 56, 128>}, {transform_indices = @transform_3, window_bounds = array<i64: 8, 128>}]} {
    %c0 = arith.constant 0 : index
    %c0_0 = arith.constant 0 : index
    %0 = vector.load %arg1[%c0, %c0_0] : memref<8x16xf32, #tpu.memory_space<vmem>>, vector<8x16xf32>
    %c0_1 = arith.constant 0 : index
    %c0_2 = arith.constant 0 : index
    %1 = vector.load %arg2[%c0_1, %c0_2] : memref<8x32xf32, #tpu.memory_space<vmem>>, vector<8x32xf32>
    %c0_3 = arith.constant 0 : index
    %c0_4 = arith.constant 0 : index
    %2 = vector.load %arg3[%c0_3, %c0_4] : memref<56x128xf32, #tpu.memory_space<vmem>>, vector<16x128xf32>
    %cst = arith.constant dense<0.000000e+00> : vector<8x128xf32>
    %3 = tpu.matmul %0, %2, %cst {dimension_numbers = #tpu.dot_dimension_numbers<[1], [0], [0], [1], [0, 0, 1, 1], [], []>} : vector<8x16xf32>, vector<16x128xf32>, vector<8x128xf32> -> vector<8x128xf32>
    %c16 = arith.constant 16 : index
    %c0_5 = arith.constant 0 : index
    %4 = vector.load %arg3[%c16, %c0_5] : memref<56x128xf32, #tpu.memory_space<vmem>>, vector<32x128xf32>
    %cst_6 = arith.constant dense<0.000000e+00> : vector<8x128xf32>
    %5 = tpu.matmul %1, %4, %cst_6 {dimension_numbers = #tpu.dot_dimension_numbers<[1], [0], [0], [1], [0, 0, 1, 1], [], []>} : vector<8x32xf32>, vector<32x128xf32>, vector<8x128xf32> -> vector<8x128xf32>
    %c48 = arith.constant 48 : index
    %c0_7 = arith.constant 0 : index
    %6 = vector.load %arg3[%c48, %c0_7] : memref<56x128xf32, #tpu.memory_space<vmem>>, vector<8x128xf32>
    %7 = vector.extract_strided_slice %6 {offsets = [0, 0], sizes = [1, 128], strides = [1, 1]} : vector<8x128xf32> to vector<1x128xf32>
    %8 = vector.extract_strided_slice %6 {offsets = [1, 0], sizes = [1, 128], strides = [1, 1]} : vector<8x128xf32> to vector<1x128xf32>
    %9 = vector.extract_strided_slice %6 {offsets = [2, 0], sizes = [1, 128], strides = [1, 1]} : vector<8x128xf32> to vector<1x128xf32>
    %10 = vector.extract_strided_slice %6 {offsets = [3, 0], sizes = [1, 128], strides = [1, 1]} : vector<8x128xf32> to vector<1x128xf32>
    %11 = vector.extract_strided_slice %6 {offsets = [4, 0], sizes = [1, 1], strides = [1, 1]} : vector<8x128xf32> to vector<1x1xf32>
    %12 = vector.extract_strided_slice %6 {offsets = [4, 1], sizes = [1, 1], strides = [1, 1]} : vector<8x128xf32> to vector<1x1xf32>
    %13 = arith.mulf %3, %5 : vector<8x128xf32>
    %cst_8 = arith.constant dense<0.000000e+00> : vector<8xf32>
    %14 = vector.multi_reduction <add>, %13, %cst_8 [1] : vector<8x128xf32> to vector<8xf32>
    %15 = vector.shape_cast %14 : vector<8xf32> to vector<8x1xf32>
    %16 = vector.broadcast %11 : vector<1x1xf32> to vector<8x1xf32>
    %17 = arith.addf %15, %16 : vector<8x1xf32>
    %18 = vector.broadcast %8 : vector<1x128xf32> to vector<8x128xf32>
    %19 = arith.mulf %3, %18 : vector<8x128xf32>
    %20 = vector.broadcast %9 : vector<1x128xf32> to vector<8x128xf32>
    %21 = arith.mulf %5, %20 : vector<8x128xf32>
    %22 = arith.addf %19, %21 : vector<8x128xf32>
    %23 = arith.subf %3, %5 : vector<8x128xf32>
    %24 = math.absf %23 : vector<8x128xf32>
    %25 = vector.broadcast %10 : vector<1x128xf32> to vector<8x128xf32>
    %26 = arith.mulf %24, %25 : vector<8x128xf32>
    %27 = arith.addf %22, %26 : vector<8x128xf32>
    %cst_9 = arith.constant dense<0.000000e+00> : vector<8xf32>
    %28 = vector.multi_reduction <add>, %27, %cst_9 [1] : vector<8x128xf32> to vector<8xf32>
    %29 = vector.shape_cast %28 : vector<8xf32> to vector<8x1xf32>
    %30 = vector.broadcast %12 : vector<1x1xf32> to vector<8x1xf32>
    %31 = arith.addf %29, %30 : vector<8x1xf32>
    %cst_10 = arith.constant 0.000000e+00 : f32
    %32 = vector.broadcast %cst_10 : f32 to vector<8x1xf32>
    %33 = arith.maximumf %31, %32 : vector<8x1xf32>
    %34 = vector.broadcast %cst_10 : f32 to vector<8x1xf32>
    %35 = arith.subf %31, %34 : vector<8x1xf32>
    %36 = arith.cmpf one, %35, %35 : vector<8x1xf32>
    %37 = vector.broadcast %cst_10 : f32 to vector<8x1xf32>
    %38 = arith.addf %31, %37 : vector<8x1xf32>
    %39 = math.absf %35 : vector<8x1xf32>
    %cst_11 = arith.constant 0.000000e+00 : f32
    %40 = vector.broadcast %cst_11 : f32 to vector<8x1xf32>
    %41 = arith.subf %40, %39 : vector<8x1xf32>
    %42 = math.exp %41 : vector<8x1xf32>
    %43 = math.log1p %42 : vector<8x1xf32>
    %44 = arith.addf %33, %43 : vector<8x1xf32>
    %45 = arith.select %36, %38, %44 : vector<8x1xi1>, vector<8x1xf32>
    %cst_12 = arith.constant 9.99999974E-5 : f32
    %46 = vector.broadcast %cst_12 : f32 to vector<8x1xf32>
    %47 = arith.addf %45, %46 : vector<8x1xf32>
    %48 = vector.broadcast %7 : vector<1x128xf32> to vector<8x128xf32>
    %49 = arith.addf %3, %48 : vector<8x128xf32>
    %50 = tpu.iota {dimensions = array<i32: 1>} : vector<8x128xi32>
    %c8_i32 = arith.constant 8 : i32
    %51 = vector.broadcast %c8_i32 : i32 to vector<8x128xi32>
    %52 = arith.cmpi eq, %50, %51 : vector<8x128xi32>
    %53 = vector.shape_cast %17 : vector<8x1xf32> to vector<8x1xf32>
    %54 = vector.broadcast %53 : vector<8x1xf32> to vector<8x128xf32>
    %55 = arith.select %52, %54, %49 : vector<8x128xi1>, vector<8x128xf32>
    %c9_i32 = arith.constant 9 : i32
    %56 = vector.broadcast %c9_i32 : i32 to vector<8x128xi32>
    %57 = arith.cmpi eq, %50, %56 : vector<8x128xi32>
    %58 = vector.shape_cast %47 : vector<8x1xf32> to vector<8x1xf32>
    %59 = vector.broadcast %58 : vector<8x1xf32> to vector<8x128xf32>
    %60 = arith.select %57, %59, %55 : vector<8x128xi1>, vector<8x128xf32>
    %c0_13 = arith.constant 0 : index
    %c0_14 = arith.constant 0 : index
    %61 = vector.load %arg4[%c0_13, %c0_14] : memref<8x128xf32, #tpu.memory_space<vmem>>, vector<8x128xf32>
    tpu.vector_store %arg4[%c0_13, %c0_14], %60 {strides = array<i32>} : memref<8x128xf32, #tpu.memory_space<vmem>>, vector<8x128xf32>,
    return
  }
  func.func @transform_0(%arg0: i32) -> (i32, i32) {
    %c0_i32 = arith.constant 0 : i32
    %c0_i32_0 = arith.constant 0 : i32
    return %arg0, %c0_i32 : i32, i32
  }
  func.func @transform_1(%arg0: i32) -> (i32, i32) {
    %c0_i32 = arith.constant 0 : i32
    %c0_i32_0 = arith.constant 0 : i32
    return %arg0, %c0_i32 : i32, i32
  }
  func.func @transform_2(%arg0: i32) -> (i32, i32) {
    %c0_i32 = arith.constant 0 : i32
    %c0_i32_0 = arith.constant 0 : i32
    %c0_i32_1 = arith.constant 0 : i32
    return %c0_i32, %c0_i32_0 : i32, i32
  }
  func.func @transform_3(%arg0: i32) -> (i32, i32) {
    %c0_i32 = arith.constant 0 : i32
    %c0_i32_0 = arith.constant 0 : i32
    return %arg0, %c0_i32 : i32, i32
  }
}

</mosaic_0001>

<bundles_post_ra>
// kernel: gnimc_forward.1
= control target key start
LH: loop header
LB: loop body
LE: loop exit
PB: predicated region body
PF: predicated region fallthrough
CT: control target
= control target key end

     0   :  { %v295_v0 = vmov 0.0|0.0   ;;  %vm296_vm0 = vmmov 0   ;;  %v297_v8 = vmov 0.0   ;;  %vm18_vm1 = vcmask 130048   ;;  %s350_s2 = inlined_call_operand.vmem [shape: f32[56,128], index: 2, kind: input, shape index: {}]   ;;  %s351_s0 = inlined_call_operand.vmem [shape: f32[8,16], index: 0, kind: input, shape index: {}]   ;;  %s352_s1 = inlined_call_operand.vmem [shape: f32[8,32], index: 1, kind: input, shape index: {}]   ;;  %s353_s3 = inlined_call_operand.vmem [shape: f32[8,128], index: 3, kind: output, shape index: {}]  }
   0x1   :  { %277 = vmatprep.subr.bf16.mxu1 %v295_v0  ;;  %v92_v1 = vld [vmem:[%s350_s2 + $0x10] sm:$0xff]  ;;  %v93_v2 = vld [vmem:[%s350_s2 + $0x18] sm:$0xff]  ;;  %274 = vmatprep.subr.bf16.mxu0 %v295_v0  ;;  %v16_v3 = vld [vmem:[%s350_s2] sm:$0xff]  ;;  %vm96_vm2 = vcmask 261120   ;;  %v174_v13 = vlaneseq  ;;  %v298_v39 = vmov 0   ;;  %v299_v40 = vmov 1  }
   0x2   :  { %v278_v4 = vpack.c.bf16 %v93_v2, %v92_v1  ;;  %v17_v5 = vld [vmem:[%s350_s2 + $0x8] sm:$0xff]  ;;  %v94_v6 = vld [vmem:[%s350_s2 + $0x20] sm:$0xff]  ;;  %260 = vmatprep.mubr.msk.f32.mxu0 %vm296_vm0, %v297_v8  ;;  %271 = vmatprep.mubr.msk.f32.mxu1 %vm296_vm0, %v297_v8  ;;  %v170_v15 = vld [vmem:[%s350_s2 + $0x30] sm:$0xff] }
   0x3   :  { %v95_v7 = vld [vmem:[%s350_s2 + $0x28] sm:$0xff]  ;;  %v275_v9 = vpack.c.bf16 %v17_v5, %v16_v3  ;;  %v14_v11 = vld [vmem:[%s351_s0] sm:$0xff]  ;;  %v175_v14 = vshrl.u32 %v174_v13, 7  ;;  %288 = vset.pattern.permute.xlu1 %v298_v39  ;;  %290 = vset.pattern.permute.xlu0 %v299_v40  ;;  %v226_v61 = vand.u32 127, %v174_v13 }
   0x4   :  { %279 = vmatpush3.bf16.msra.mxu1 %v278_v4  ;;  %v281_v10 = vpack.c.bf16 %v95_v7, %v94_v6  ;;  %v15_v12 = vld [vmem:[%s352_s1] sm:$0xff] }
   0x5   :  { %276 = vmatpush3.bf16.msra.mxu0 %v275_v9  ;;  %280 = vmatprep.subr.bf16.mxu1 %v295_v0  ;;  %v222_v16 = vsub.s32 0, %v175_v14  ;;  %v176_v18 = vsub.s32 4, %v175_v14  ;;  %v181_v20 = vsub.s32 1, %v175_v14  ;;  %v186_v21 = vsub.s32 2, %v175_v14 }
   0x6   :  { %v194_v25 = vsub.s32 3, %v175_v14  ;;  %vm227_vm5 = vcmp.eq.s32.totalorder %v226_v61, 8  ;;  %vm234_vm6 = vcmp.eq.s32.totalorder %v226_v61, 9 }
   0x7   :  { %v223_v17 = vrot.slane %v170_v15, %v222_v16  ;;  %v177_v19 = vrot.slane %v170_v15, %v176_v18  ;;  %v182_v22 = vrot.slane %v170_v15, %v181_v20  ;;  %v187_v24 = vrot.slane %v170_v15, %v186_v21 }
   0x8   :  { %282 = vmatpush3.bf16.msra.mxu1 %v281_v10  ;;  %261 = vmatmul.mubr.msk.f32.vlgmr.msra.gmra.mrb[0].mxu0 %vm18_vm1, %v14_v11  ;;  %v195_v33 = vrot.slane %v170_v15, %v194_v25 }
   0xb   :  { %272 = vmatmul.mubr.msk.f32.vlgmr.msra.gmra.mrb[0].mxu1 %vm96_vm2, %v15_v12 }
  0xdb   :  { %v88_v23 = vpop.f32.mrb[0].mxu0 }
  0xdc   :  { %v224_v26 = vadd.f32 %v223_v17, %v88_v23  ;;  %v262_v27 = vpop.f32.mrb[1].mxu0  ;;  %v183_v28 = vmul.f32 %v182_v22, %v88_v23 }
  0xde   :  { %v166_v29 = vpop.f32.mrb[0].mxu1 }
  0xdf   :  { %v188_v30 = vmul.f32 %v187_v24, %v166_v29  ;;  %v190_v31 = vsub.f32 %v88_v23, %v166_v29  ;;  %v273_v32 = vpop.f32.mrb[1].mxu1  ;;  %v171_v34 = vmul.f32 %v166_v29, %v88_v23 }
  0xe1   :  { %v189_v35 = vadd.f32 %v188_v30, %v183_v28  ;;  %v191_v36 = vand.u32 2147483647, %v190_v31 }
  0xe3   :  { %v196_v37 = vmul.f32 %v195_v33, %v191_v36 }
  0xe5   :  { %v197_v38 = vadd.f32 %v196_v37, %v189_v35 }
  0xe7   :  { %198 = vadd.xlane.f32.xlu0 %v197_v38 }
  0xeb   :  { %172 = vadd.xlane.f32.xlu0 %v171_v34 }
 0x174   :  { %v199_v41 = vpop.xlane.xlu0 %198 }
 0x175   :  { %v200_v42 = vadd.f32 %v199_v41, %v177_v19 }
 0x177   :  { %v204_v43 = vand.u32 2147483647, %v200_v42  ;;  %v201_v56 = vmax.f32 %v200_v42, 0.0  ;;  %vm202_vm4 = vcmp.ne.f32.partialorder %v200_v42, %v200_v42 }
 0x178   :  { %v173_v44 = vpop.xlane.xlu0 %172 }
 0x179   :  { %v205_v45 = vsub.f32 0.0, %v204_v43  ;;  %v178_v46 = vadd.f32 %v177_v19, %v173_v44 }
 0x17b   :  { %v206_v47 = vmul.f32 1.442695, %v205_v45  ;;  %230 = vperm.xlu1 %288, %v178_v46  }
 0x17d   :  { %291 = vpow2.f32 %v206_v47 }
 0x17f   :  { %289 = vset.pattern.permute.xlu1 %v299_v40 }
 0x187   :  { %v292_v48 = vpop.eup %291 }
 0x188   :  { %v208_v49 = vadd.f32 1.0, %v292_v48  ;;  %v211_v50 = vmul.f32 -0.5, %v292_v48  ;;  %v214_v52 = vand.u32 2147483647, %v292_v48 }
 0x18a   :  { %293 = vlog2.f32 %v208_v49  ;;  %v212_v51 = vadd.f32 1.0, %v211_v50  ;;  %vm215_vm3 = vcmp.lt.f32.partialorder %v214_v52, 0.0004427343 }
 0x18c   :  { %v213_v55 = vmul.f32 %v292_v48, %v212_v51 }
 0x194   :  { %v294_v53 = vpop.eup %293 }
 0x195   :  { %v210_v54 = vmul.f32 0.6931472, %v294_v53 }
 0x197   :  { %v216_v57 = vsel %vm215_vm3, %v213_v55, %v210_v54 }
 0x198   :  { %v217_v58 = vadd.f32 %v216_v57, %v201_v56 }
 0x19a   :  { %v218_v59 = vsel %vm202_vm4, %v200_v42, %v217_v58 }
 0x19b   :  { %v219_v60 = vadd.f32 0.0001, %v218_v59 }
 0x19d   :  { %237 = vperm.xlu1 %289, %v219_v60  }
 0x1fa   :  { %v231_v62 = vpop.permute.xlu1 %230 }
 0x1fb   :  { %v233_v63 = vsel %vm227_vm5, %v231_v62, %v224_v26 }
 0x21c   :  { %v238_v0 = vpop.permute.xlu1 %237 }
 0x21d   :  { %v240_v1 = vsel %vm234_vm6, %v238_v0, %v233_v63 }
 0x21e   :  { %241 = vst [vmem:[%s353_s3] sm:$0xff] %v240_v1 }

</bundles_post_ra>
